<compile_context>
chip_gen: v7x
topology: tpu7x:2x2x1
jax: 0.10.0
libtpu: 0.0.40
codegen_flags: <defaults>
</compile_context>

<pallas_src>
import jax
import jax.numpy as jnp
from jax import lax
from jax.experimental import pallas as pl
from jax.experimental.pallas import tpu as pltpu


# ----------------------------------------------------------------------------
# Kernel 1 (inference path): Linear layer  y = x @ W + b   with W = (D, H)
# ----------------------------------------------------------------------------
def linear_kernel(x_ref, w_ref, b_ref, o_ref):
    x = x_ref[...]                      # (B, D)
    w = w_ref[...]                      # (D, H)  pre-transposed once at init
    b = b_ref[...]                      # (1, H)
    y = jnp.dot(x, w, preferred_element_type=jnp.float32)   # canonical MXU feed
    o_ref[...] = (y + b).astype(o_ref.dtype)


@jax.jit
def linear(x, w, b):
    B = x.shape[0]
    H = w.shape[1]
    return pl.pallas_call(
        linear_kernel,
        out_shape=jax.ShapeDtypeStruct((B, H), jnp.float32),
        in_specs=[pl.BlockSpec(memory_space=pltpu.VMEM)] * 3,
        out_specs=pl.BlockSpec(memory_space=pltpu.VMEM),
    )(x, w, b.reshape(1, H))


# ----------------------------------------------------------------------------
# Kernel 2 (training path): fused Linear + softmax cross-entropy (mean reduce)
#   loss = mean_i( logsumexp(logits_i) - logits_i[label_i] )
# Logits live only in vregs; labels arrive as a (B,1) int32 VMEM tile and the
# "gather" is one vectorized iota-compare + masked sum (no one-hot input).
# ----------------------------------------------------------------------------
def fused_linear_ce_kernel(x_ref, w_ref, b_ref, labels_ref, loss_ref):
    x = x_ref[...]                      # (B, D)
    w = w_ref[...]                      # (D, H)
    b = b_ref[...]                      # (1, H)
    labels = labels_ref[...]            # (B, 1) int32

    logits = jnp.dot(x, w, preferred_element_type=jnp.float32) + b   # (B, H)
    B, H = logits.shape

    # Numerically stable log-sum-exp over the class (lane) axis — all f32
    # (keeps VPU/EUP epilogue math in f32, required on v5e, accurate everywhere).
    m = jnp.max(logits, axis=-1, keepdims=True)                       # (B, 1)
    lse = m + jnp.log(jnp.sum(jnp.exp(logits - m), axis=-1, keepdims=True))

    # picked_i = logits[i, label_i] : one vector compare + select, any B.
    lane_id = lax.broadcasted_iota(jnp.int32, (B, H), 1)
    picked = jnp.sum(jnp.where(lane_id == labels, logits, 0.0),
                     axis=-1, keepdims=True)                          # (B, 1)
    # TODO(synk): out-of-range labels silently yield picked=0 instead of
    # raising like torch's cross_entropy; add pl.debug_check if that matters.

    loss_ref[0, 0] = jnp.mean(lse - picked)      # scalar result on the SMEM path


@jax.jit
def linear_cross_entropy(x, w, b, labels_int):
    B = x.shape[0]
    H = w.shape[1]
    out = pl.pallas_call(
        fused_linear_ce_kernel,
        out_shape=jax.ShapeDtypeStruct((1, 1), jnp.float32),
        in_specs=[
            pl.BlockSpec(memory_space=pltpu.VMEM),   # x
            pl.BlockSpec(memory_space=pltpu.VMEM),   # w (D, H)
            pl.BlockSpec(memory_space=pltpu.VMEM),   # b (1, H)
            pl.BlockSpec(memory_space=pltpu.VMEM),   # labels (B, 1) int32
        ],
        out_specs=pl.BlockSpec(memory_space=pltpu.SMEM),   # (1,1) scalar loss
    )(x, w, b.reshape(1, H), labels_int.astype(jnp.int32).reshape(B, 1))
    return out[0, 0]


# ----------------------------------------------------------------------------
# TorchModel equivalent
# ----------------------------------------------------------------------------
class TorchModelPallas:
    def __init__(self, input_size, hidden1_size, key):
        # PyTorch nn.Linear default init: U(-k, k), k = 1/sqrt(in_features).
        kw, kb = jax.random.split(key)
        bound = 1.0 / jnp.sqrt(jnp.float32(input_size))
        w_torch_layout = jax.random.uniform(
            kw, (hidden1_size, input_size), jnp.float32, -bound, bound)
        # Pre-transpose ONCE to (D, H): keeps both kernels on the canonical
        # (M,K)x(K,N) MXU contraction with zero per-call cost.
        self.w = jnp.transpose(w_torch_layout)                 # (D, H)
        self.b = jax.random.uniform(
            kb, (hidden1_size,), jnp.float32, -bound, bound)   # (H,)

    def __call__(self, x, y_act=None):
        if y_act is None:
            return linear(x, self.w, self.b)                    # inference: logits
        return linear_cross_entropy(x, self.w, self.b, y_act)  # training: loss


if __name__ == "__main__":
    key = jax.random.PRNGKey(0)
    k_param, k_x, k_y = jax.random.split(key, 3)

    batch = 8
    input_size = 32
    hidden1_size = 16

    model = TorchModelPallas(input_size, hidden1_size, k_param)

    x = jax.random.normal(k_x, (batch, input_size), dtype=jnp.float32)
    y_act = jax.random.randint(k_y, (batch,), 0, hidden1_size, dtype=jnp.int32)

    # Inference path (no labels) -> logits
    y_pred = model(x)
    y_pred = jax.block_until_ready(y_pred)
    assert y_pred.shape == (batch, hidden1_size)

    # Training path (with labels) -> scalar cross-entropy loss (single fused kernel)
    loss = model(x, y_act)
    loss = jax.block_until_ready(loss)
    assert loss.shape == ()
    assert bool(jnp.isfinite(loss))

    print("KERNEL_OK")
</pallas_src>

<mosaic_0001>
module attributes {stable_mosaic.version = 11 : i64} {
  func.func @linear_kernel(%arg0: memref<8x32xf32, #tpu.memory_space<vmem>>, %arg1: memref<32x16xf32, #tpu.memory_space<vmem>>, %arg2: memref<1x16xf32, #tpu.memory_space<vmem>>, %arg3: memref<8x16xf32, #tpu.memory_space<vmem>>) attributes {dimension_semantics = [], scalar_prefetch = 0 : i64, scratch_operands = 0 : i64, tpu.core_type = #tpu.core_type<tc>} {
    %c0 = arith.constant 0 : index
    %c0_0 = arith.constant 0 : index
    %0 = vector.load %arg0[%c0, %c0_0] : memref<8x32xf32, #tpu.memory_space<vmem>>, vector<8x32xf32>
    %c0_1 = arith.constant 0 : index
    %c0_2 = arith.constant 0 : index
    %1 = vector.load %arg1[%c0_1, %c0_2] : memref<32x16xf32, #tpu.memory_space<vmem>>, vector<32x16xf32>
    %c0_3 = arith.constant 0 : index
    %c0_4 = arith.constant 0 : index
    %2 = vector.load %arg2[%c0_3, %c0_4] : memref<1x16xf32, #tpu.memory_space<vmem>>, vector<1x16xf32>
    %cst = arith.constant dense<0.000000e+00> : vector<8x16xf32>
    %3 = tpu.matmul %0, %1, %cst {dimension_numbers = #tpu.dot_dimension_numbers<[1], [0], [0], [1], [0, 0, 1, 1], [], []>} : vector<8x32xf32>, vector<32x16xf32>, vector<8x16xf32> -> vector<8x16xf32>
    %4 = vector.broadcast %2 : vector<1x16xf32> to vector<8x16xf32>
    %5 = arith.addf %3, %4 : vector<8x16xf32>
    %c0_5 = arith.constant 0 : index
    %c0_6 = arith.constant 0 : index
    %6 = vector.load %arg3[%c0_5, %c0_6] : memref<8x16xf32, #tpu.memory_space<vmem>>, vector<8x16xf32>
    tpu.vector_store %arg3[%c0_5, %c0_6], %5 {strides = array<i32>} : memref<8x16xf32, #tpu.memory_space<vmem>>, vector<8x16xf32>,
    return
  }
}

</mosaic_0001>

<bundles_post_ra>
// kernel: linear.1
= control target key start
LH: loop header
LB: loop body
LE: loop exit
PB: predicated region body
PF: predicated region fallthrough
CT: control target
= control target key end

     0   :  { %v169_v3 = vmov 0.0|0.0   ;;  %vm170_vm0 = vmmov 0   ;;  %v171_v6 = vmov 0.0   ;;  %s223_s0 = inlined_call_operand.vmem [shape: f32[8,32], index: 0, kind: input, shape index: {}]   ;;  %s224_s1 = inlined_call_operand.vmem [shape: f32[32,16], index: 1, kind: input, shape index: {}]   ;;  %s225_s2 = inlined_call_operand.vmem [shape: f32[1,16], index: 2, kind: input, shape index: {}]   ;;  %s226_s3 = inlined_call_operand.hbm [shape: f32[8,16], index: 3, kind: output, shape index: {}]  }
   0x1   :  { %v16_v0 = vld [vmem:[%s224_s1] sm:$0xff]  ;;  %v17_v1 = vld [vmem:[%s224_s1 + $0x8] sm:$0xff]  ;;  %v18_v2 = vld [vmem:[%s224_s1 + $0x10] sm:$0xff]  ;;  %135 = vmatprep.subr.bf16.mxu0 %v169_v3  ;;  %132 = vmatprep.mubr.msk.f32.mxu0 %vm170_vm0, %v171_v6 }
   0x2   :  { %v136_v4 = vpack.c.bf16 %v17_v1, %v16_v0  ;;  %v19_v5 = vld [vmem:[%s224_s1 + $0x18] sm:$0xff] }
   0x3   :  { %8 = vsyncpa [#allocation3], 0  ;;  %v139_v7 = vpack.c.bf16 %v19_v5, %v18_v2  ;;  %v15_v8 = vld [vmem:[%s223_s0] sm:$0xff]  ;;  %vm27_vm1 = vcmask 261120   ;;  %s172_s24 = smov [#allocation2]   ;;  %vm101_vm2 = vcmask 130048  }
   0x4   :  { %137 = vmatpush3.bf16.msra.mxu0 %v136_v4  ;;  %v117_v9 = vld [vmem:[%s225_s2] ss:$0 sm:$0xff]  ;;  %s109_s1 = sshll.u32 %s172_s24, 4  ;;  %s110_s1 = int_to_ptr.vmem [resolvable:$true] %s109_s1 }
   0x5   :  { %138 = vmatprep.subr.bf16.mxu0 %v169_v3  ;;  %s145_s25 = scalar_lea.vmem %s110_s1, 128  ;;  %p150_p1 = scmp.lt.s32.totalorder %s110_s1, %s110_s1 }
   0x6   :  { %p146_p0 = scmp.ne.s32.totalorder %s110_s1, %s145_s25  ;;  %p151_p2 = scmp.lt.s32.totalorder %s145_s25, %s145_s25 }
   0x8   :  { %140 = vmatpush3.bf16.msra.mxu0 %v139_v7  ;;  %p152_p3 = por %p151_p2, %p150_p1 }
   0xa   :  { %p153_p4 = pnand %p152_p3, %p146_p0 }
   0xb   :  { %133 = vmatmul.mubr.msk.f32.vlgmr.msra.gmra.mrb[0].mxu0 %vm27_vm1, %v15_v8 }
  0xde   :  { %v97_v10 = vpop.f32.mrb[0].mxu0 }
  0xdf   :  { %v98_v11 = vadd.f32 %v117_v9, %v97_v10  ;;  %v134_v12 = vpop.f32.mrb[1].mxu0 }
  0xe1   :  { %102 = vst.msk [vmem:[#allocation2] sm:$0xff] %vm101_vm2, %v98_v11 }
  0xe2   :  { %156 = shalt.err (!%p153_p4)
}
  0xe3   :  { %s157_s27 = scalar_lea.hbm %s226_s3, 128 }
  0xe4   :  { %p158_p5 = scmp.ne.s32.totalorder %s226_s3, %s157_s27  ;;  %p161_p6 = scmp.lt.u32.totalorder %s157_s27, %s226_s3 }
  0xe6   :  { %p163_p7 = pnand %p161_p6, %p158_p5 }
  0xe8   :  { %166 = shalt.err (!%p163_p7)
}
  0xe9   :  { %112 = dma.vmem_to_hbm [thread:$0]  %s110_s1, 128, %s226_s3, [#allocation3]  }
  0xea   :  { %167 = dma.done.wait [#allocation3], 128  }
  0xeb   :  { %168 = vsyncadd [#allocation3], 4294967168 }
  0xec   :  { %116 = vsyncpa [#allocation3], 1 }

</bundles_post_ra>
